<compile_context>
chip_gen: v6e
topology: v6e:2x2x1
jax: 0.10.0
libtpu: 0.0.40
codegen_flags: <defaults>
</compile_context>

<pallas_src>
import jax
import jax.numpy as jnp
from jax.experimental import pallas as pl
from jax.experimental.pallas import tpu as pltpu

LEAKY_SLOPE = 0.01  # PyTorch nn.LeakyReLU default negative_slope
SUBLANE = 8


def _round_up(x, m):
    return ((x + m - 1) // m) * m


def _ft_policy_kernel(s_ref, w1_ref, b1_ref, w2_ref, b2_ref, w3_ref, b3_ref, o_ref):
    hi = jax.lax.Precision.HIGHEST

    x = s_ref[...]  # (TM, state_dim) f32

    # Linear 1 + LeakyReLU
    h1 = jnp.dot(x, w1_ref[...], preferred_element_type=jnp.float32,
                 precision=hi) + b1_ref[...]
    h1 = jnp.maximum(h1, LEAKY_SLOPE * h1)

    # Linear 2 + LeakyReLU
    h2 = jnp.dot(h1, w2_ref[...], preferred_element_type=jnp.float32,
                 precision=hi) + b2_ref[...]
    h2 = jnp.maximum(h2, LEAKY_SLOPE * h2)

    # Linear 3 (logits) -- no padded action lanes, so no masking needed.
    logits = jnp.dot(h2, w3_ref[...], preferred_element_type=jnp.float32,
                     precision=hi) + b3_ref[...]

    # Numerically stable softmax over dim=1 (exact divide for accuracy).
    m = jnp.max(logits, axis=1, keepdims=True)
    e = jnp.exp(logits - m)
    denom = jnp.sum(e, axis=1, keepdims=True)
    o_ref[...] = (e / denom).astype(o_ref.dtype)


def ft_forward_policy(s, params, *, tile_m=1024):
    """FTForwardPolicy forward pass.

    s:      (batch, state_dim) float32
    params: w1 (state_dim, hidden), b1 (1, hidden),
            w2 (hidden, hidden),    b2 (1, hidden),
            w3 (hidden, num_actions), b3 (1, num_actions)
            (weights stored pre-transposed as (in, out), i.e. x @ W + b == x @ W_pt.T + b)
    returns (batch, num_actions) float32, rows sum to 1.
    """
    s = s.astype(jnp.float32)
    p = {k: v.astype(jnp.float32) for k, v in params.items()}

    batch, state_dim = s.shape
    hidden = p["w1"].shape[1]
    num_actions = p["w3"].shape[1]

    # Batch tile: multiple of 8 (sublane), and at least 2 grid steps whenever the
    # batch allows it so v7x's two TensorCores both get work.
    if batch >= 2 * tile_m:
        tm = tile_m
    else:
        tm = max(SUBLANE, _round_up(pl.cdiv(batch, 2), SUBLANE))
        tm = min(tm, _round_up(batch, SUBLANE))
    grid = (pl.cdiv(batch, tm),)

    return pl.pallas_call(
        _ft_policy_kernel,
        out_shape=jax.ShapeDtypeStruct((batch, num_actions), jnp.float32),
        grid=grid,
        in_specs=[
            # batch-tiled activations; last block dim == full array dim (legal
            # without 128-padding), second-to-last (tm) is a multiple of 8.
            pl.BlockSpec((tm, state_dim), lambda i: (i, 0)),
            # VMEM-resident weights / biases (constant index_map, full-array blocks)
            pl.BlockSpec((state_dim, hidden), lambda i: (0, 0)),
            pl.BlockSpec((1, hidden), lambda i: (0, 0)),
            pl.BlockSpec((hidden, hidden), lambda i: (0, 0)),
            pl.BlockSpec((1, hidden), lambda i: (0, 0)),
            pl.BlockSpec((hidden, num_actions), lambda i: (0, 0)),
            pl.BlockSpec((1, num_actions), lambda i: (0, 0)),
        ],
        out_specs=pl.BlockSpec((tm, num_actions), lambda i: (i, 0)),
        compiler_params=pltpu.CompilerParams(
            dimension_semantics=("parallel",),
        ),
    )(s, p["w1"], p["b1"], p["w2"], p["b2"], p["w3"], p["b3"])


def init_params(key, state_dim, hidden_dim, num_actions):
    """Deterministic synthetic parameter init (uniform, PyTorch-Linear-like scale)."""
    ks = jax.random.split(key, 6)

    def lin(kw, kb, fan_in, fan_out):
        bound = 1.0 / jnp.sqrt(fan_in)
        w = jax.random.uniform(kw, (fan_in, fan_out), jnp.float32, -bound, bound)
        b = jax.random.uniform(kb, (1, fan_out), jnp.float32, -bound, bound)
        return w, b

    w1, b1 = lin(ks[0], ks[1], state_dim, hidden_dim)
    w2, b2 = lin(ks[2], ks[3], hidden_dim, hidden_dim)
    w3, b3 = lin(ks[4], ks[5], hidden_dim, num_actions)
    return {"w1": w1, "b1": b1, "w2": w2, "b2": b2, "w3": w3, "b3": b3}


def _reference(s, p):
    hi = jax.lax.Precision.HIGHEST
    h1 = jnp.dot(s, p["w1"], precision=hi) + p["b1"]
    h1 = jnp.where(h1 > 0, h1, LEAKY_SLOPE * h1)
    h2 = jnp.dot(h1, p["w2"], precision=hi) + p["b2"]
    h2 = jnp.where(h2 > 0, h2, LEAKY_SLOPE * h2)
    logits = jnp.dot(h2, p["w3"], precision=hi) + p["b3"]
    return jax.nn.softmax(logits, axis=1)


if __name__ == "__main__":
    key = jax.random.PRNGKey(0)
    k_s, k_p, k_s2 = jax.random.split(key, 3)

    batch, state_dim, hidden_dim, num_actions = 8, 16, 32, 8

    s = jax.random.normal(k_s, (batch, state_dim), jnp.float32)
    params = init_params(k_p, state_dim, hidden_dim, num_actions)

    # Small-shape run (single grid step).
    out = jax.block_until_ready(ft_forward_policy(s, params))
    ref = _reference(s, params)
    assert out.shape == (batch, num_actions)
    assert jnp.allclose(out, ref, atol=1e-4, rtol=1e-4), "mismatch vs JAX reference"
    assert jnp.allclose(jnp.sum(out, axis=1), 1.0, atol=1e-4), "softmax rows must sum to 1"

    # Larger, non-divisible batch with a multi-step grid (exercises batch tiling,
    # megacore splitting and the masked partial last block).
    batch2 = 300
    s2 = jax.random.normal(k_s2, (batch2, state_dim), jnp.float32)
    out2 = jax.block_until_ready(ft_forward_policy(s2, params, tile_m=128))
    ref2 = _reference(s2, params)
    assert out2.shape == (batch2, num_actions)
    assert jnp.allclose(out2, ref2, atol=1e-4, rtol=1e-4), "tiled mismatch vs JAX reference"
    assert jnp.allclose(jnp.sum(out2, axis=1), 1.0, atol=1e-4), "tiled softmax rows must sum to 1"

    print("KERNEL_OK")
</pallas_src>

<mosaic_0001>
module attributes {stable_mosaic.version = 11 : i64} {
  func.func @_ft_policy_kernel(%arg0: i32, %arg1: memref<8x16xf32, #tpu.memory_space<vmem>>, %arg2: memref<16x32xf32, #tpu.memory_space<vmem>>, %arg3: memref<1x32xf32, #tpu.memory_space<vmem>>, %arg4: memref<32x32xf32, #tpu.memory_space<vmem>>, %arg5: memref<1x32xf32, #tpu.memory_space<vmem>>, %arg6: memref<32x8xf32, #tpu.memory_space<vmem>>, %arg7: memref<1x8xf32, #tpu.memory_space<vmem>>, %arg8: memref<8x8xf32, #tpu.memory_space<vmem>>) attributes {dimension_semantics = [#tpu.dimension_semantics<parallel>], iteration_bounds = array<i64: 1>, scalar_prefetch = 0 : i64, scratch_operands = 0 : i64, tpu.core_type = #tpu.core_type<tc>, window_params = [{transform_indices = @transform_0, window_bounds = array<i64: 8, 16>}, {pipeline_mode = #tpu.pipeline_mode<synchronous>, transform_indices = @transform_1, window_bounds = array<i64: 16, 32>}, {pipeline_mode = #tpu.pipeline_mode<synchronous>, transform_indices = @transform_2, window_bounds = array<i64: 1, 32>}, {pipeline_mode = #tpu.pipeline_mode<synchronous>, transform_indices = @transform_3, window_bounds = array<i64: 32, 32>}, {pipeline_mode = #tpu.pipeline_mode<synchronous>, transform_indices = @transform_4, window_bounds = array<i64: 1, 32>}, {pipeline_mode = #tpu.pipeline_mode<synchronous>, transform_indices = @transform_5, window_bounds = array<i64: 32, 8>}, {pipeline_mode = #tpu.pipeline_mode<synchronous>, transform_indices = @transform_6, window_bounds = array<i64: 1, 8>}, {transform_indices = @transform_7, window_bounds = array<i64: 8, 8>}]} {
    %c0 = arith.constant 0 : index
    %c0_0 = arith.constant 0 : index
    %0 = vector.load %arg1[%c0, %c0_0] : memref<8x16xf32, #tpu.memory_space<vmem>>, vector<8x16xf32>
    %c0_1 = arith.constant 0 : index
    %c0_2 = arith.constant 0 : index
    %1 = vector.load %arg2[%c0_1, %c0_2] : memref<16x32xf32, #tpu.memory_space<vmem>>, vector<16x32xf32>
    %cst = arith.constant dense<0.000000e+00> : vector<8x32xf32>
    %2 = tpu.matmul %0, %1, %cst {dimension_numbers = #tpu.dot_dimension_numbers<[1], [0], [0], [1], [0, 0, 1, 1], [], []>, precision = #tpu.contract_precision<fp32>} : vector<8x16xf32>, vector<16x32xf32>, vector<8x32xf32> -> vector<8x32xf32>
    %c0_3 = arith.constant 0 : index
    %c0_4 = arith.constant 0 : index
    %3 = vector.load %arg3[%c0_3, %c0_4] : memref<1x32xf32, #tpu.memory_space<vmem>>, vector<1x32xf32>
    %4 = vector.broadcast %3 : vector<1x32xf32> to vector<8x32xf32>
    %5 = arith.addf %2, %4 : vector<8x32xf32>
    %cst_5 = arith.constant 0.00999999977 : f32
    %6 = vector.broadcast %cst_5 : f32 to vector<8x32xf32>
    %7 = arith.mulf %6, %5 : vector<8x32xf32>
    %8 = arith.maximumf %5, %7 : vector<8x32xf32>
    %c0_6 = arith.constant 0 : index
    %c0_7 = arith.constant 0 : index
    %9 = vector.load %arg4[%c0_6, %c0_7] : memref<32x32xf32, #tpu.memory_space<vmem>>, vector<32x32xf32>
    %cst_8 = arith.constant dense<0.000000e+00> : vector<8x32xf32>
    %10 = tpu.matmul %8, %9, %cst_8 {dimension_numbers = #tpu.dot_dimension_numbers<[1], [0], [0], [1], [0, 0, 1, 1], [], []>, precision = #tpu.contract_precision<fp32>} : vector<8x32xf32>, vector<32x32xf32>, vector<8x32xf32> -> vector<8x32xf32>
    %c0_9 = arith.constant 0 : index
    %c0_10 = arith.constant 0 : index
    %11 = vector.load %arg5[%c0_9, %c0_10] : memref<1x32xf32, #tpu.memory_space<vmem>>, vector<1x32xf32>
    %12 = vector.broadcast %11 : vector<1x32xf32> to vector<8x32xf32>
    %13 = arith.addf %10, %12 : vector<8x32xf32>
    %cst_11 = arith.constant 0.00999999977 : f32
    %14 = vector.broadcast %cst_11 : f32 to vector<8x32xf32>
    %15 = arith.mulf %14, %13 : vector<8x32xf32>
    %16 = arith.maximumf %13, %15 : vector<8x32xf32>
    %c0_12 = arith.constant 0 : index
    %c0_13 = arith.constant 0 : index
    %17 = vector.load %arg6[%c0_12, %c0_13] : memref<32x8xf32, #tpu.memory_space<vmem>>, vector<32x8xf32>
    %cst_14 = arith.constant dense<0.000000e+00> : vector<8x8xf32>
    %18 = tpu.matmul %16, %17, %cst_14 {dimension_numbers = #tpu.dot_dimension_numbers<[1], [0], [0], [1], [0, 0, 1, 1], [], []>, precision = #tpu.contract_precision<fp32>} : vector<8x32xf32>, vector<32x8xf32>, vector<8x8xf32> -> vector<8x8xf32>
    %c0_15 = arith.constant 0 : index
    %c0_16 = arith.constant 0 : index
    %19 = vector.load %arg7[%c0_15, %c0_16] : memref<1x8xf32, #tpu.memory_space<vmem>>, vector<1x8xf32>
    %20 = vector.broadcast %19 : vector<1x8xf32> to vector<8x8xf32>
    %21 = arith.addf %18, %20 : vector<8x8xf32>
    %cst_17 = arith.constant dense<0xFF800000> : vector<8xf32>
    %22 = vector.multi_reduction <maximumf>, %21, %cst_17 [1] : vector<8x8xf32> to vector<8xf32>
    %23 = vector.shape_cast %22 : vector<8xf32> to vector<8x1xf32>
    %24 = vector.broadcast %23 : vector<8x1xf32> to vector<8x8xf32>
    %25 = arith.subf %21, %24 : vector<8x8xf32>
    %26 = math.exp %25 : vector<8x8xf32>
    %cst_18 = arith.constant dense<0.000000e+00> : vector<8xf32>
    %27 = vector.multi_reduction <add>, %26, %cst_18 [1] : vector<8x8xf32> to vector<8xf32>
    %28 = vector.shape_cast %27 : vector<8xf32> to vector<8x1xf32>
    %29 = vector.broadcast %28 : vector<8x1xf32> to vector<8x8xf32>
    %30 = arith.divf %26, %29 : vector<8x8xf32>
    %c0_19 = arith.constant 0 : index
    %c0_20 = arith.constant 0 : index
    %31 = vector.load %arg8[%c0_19, %c0_20] : memref<8x8xf32, #tpu.memory_space<vmem>>, vector<8x8xf32>
    tpu.vector_store %arg8[%c0_19, %c0_20], %30 {strides = array<i32>} : memref<8x8xf32, #tpu.memory_space<vmem>>, vector<8x8xf32>,
    return
  }
  func.func @transform_0(%arg0: i32) -> (i32, i32) {
    %c0_i32 = arith.constant 0 : i32
    %c0_i32_0 = arith.constant 0 : i32
    return %arg0, %c0_i32 : i32, i32
  }
  func.func @transform_1(%arg0: i32) -> (i32, i32) {
    %c0_i32 = arith.constant 0 : i32
    %c0_i32_0 = arith.constant 0 : i32
    %c0_i32_1 = arith.constant 0 : i32
    return %c0_i32, %c0_i32_0 : i32, i32
  }
  func.func @transform_2(%arg0: i32) -> (i32, i32) {
    %c0_i32 = arith.constant 0 : i32
    %c0_i32_0 = arith.constant 0 : i32
    %c0_i32_1 = arith.constant 0 : i32
    return %c0_i32, %c0_i32_0 : i32, i32
  }
  func.func @transform_3(%arg0: i32) -> (i32, i32) {
    %c0_i32 = arith.constant 0 : i32
    %c0_i32_0 = arith.constant 0 : i32
    %c0_i32_1 = arith.constant 0 : i32
    return %c0_i32, %c0_i32_0 : i32, i32
  }
  func.func @transform_4(%arg0: i32) -> (i32, i32) {
    %c0_i32 = arith.constant 0 : i32
    %c0_i32_0 = arith.constant 0 : i32
    %c0_i32_1 = arith.constant 0 : i32
    return %c0_i32, %c0_i32_0 : i32, i32
  }
  func.func @transform_5(%arg0: i32) -> (i32, i32) {
    %c0_i32 = arith.constant 0 : i32
    %c0_i32_0 = arith.constant 0 : i32
    %c0_i32_1 = arith.constant 0 : i32
    return %c0_i32, %c0_i32_0 : i32, i32
  }
  func.func @transform_6(%arg0: i32) -> (i32, i32) {
    %c0_i32 = arith.constant 0 : i32
    %c0_i32_0 = arith.constant 0 : i32
    %c0_i32_1 = arith.constant 0 : i32
    return %c0_i32, %c0_i32_0 : i32, i32
  }
  func.func @transform_7(%arg0: i32) -> (i32, i32) {
    %c0_i32 = arith.constant 0 : i32
    %c0_i32_0 = arith.constant 0 : i32
    return %arg0, %c0_i32 : i32, i32
  }
}

</mosaic_0001>

<bundles_post_ra>
// kernel: tpu_custom_call.1
= control target key start
LH: loop header
LB: loop body
LE: loop exit
PB: predicated region body
PF: predicated region fallthrough
CT: control target
= control target key end

     0   :  { %12 = vsyncpa [#allocation3], 0  ;;  %s2200_s0 = inlined_call_operand.vmem [shape: f32[8,16], index: 0, kind: input, shape index: {}]   ;;  %s2201_s1 = inlined_call_operand.hbm [shape: f32[16,32], index: 1, kind: input, shape index: {}]   ;;  %s2202_s2 = inlined_call_operand.vmem [shape: f32[1,32], index: 2, kind: input, shape index: {}]   ;;  %s2203_s3 = inlined_call_operand.vmem [shape: f32[32,32], index: 3, kind: input, shape index: {}]   ;;  %s2204_s4 = inlined_call_operand.hbm [shape: f32[1,32], index: 4, kind: input, shape index: {}]   ;;  %s2205_s5 = inlined_call_operand.vmem [shape: f32[32,8], index: 5, kind: input, shape index: {}]   ;;  %s2206_s6 = inlined_call_operand.vmem [shape: f32[1,8], index: 6, kind: input, shape index: {}]   ;;  %s2207_s7 = inlined_call_operand.hbm [shape: f32[8,8], index: 7, kind: output, shape index: {}]  }
   0x1   :  { %13 = vsyncpa [#allocation6], 0 }
   0x2   :  { %14 = vsyncpa [#allocation4], 0  ;;  %s1890_s24 = smov [#allocation2]  }
   0x3   :  { %s22_s25 = sshll.u32 %s1890_s24, 4  ;;  %s23_s25 = int_to_ptr.vmem [resolvable:$true] %s22_s25 }
   0x4   :  { %s1832_s26 = scalar_lea.vmem %s23_s25, 256  ;;  %p1837_p1 = scmp.lt.s32.totalorder %s23_s25, %s23_s25 }
   0x5   :  { %p1833_p0 = scmp.ne.s32.totalorder %s23_s25, %s1832_s26  ;;  %p1838_p2 = scmp.lt.s32.totalorder %s1832_s26, %s1832_s26 }
   0x7   :  { %p1839_p3 = por %p1838_p2, %p1837_p1 }
   0x9   :  { %p1840_p4 = pnand %p1839_p3, %p1833_p0 }
   0xb   :  { %1843 = shalt.err (!%p1840_p4)
}
   0xc   :  { %s1891_s27 = smov 128   ;;  %s1892_s28 = smov 8  }
   0xd   :  { %28 = dma.hbm_to_vmem [thread:$0]  %s2201_s1, 256, %s23_s25, [#allocation3], %s1891_s27, %s1891_s27, %s1892_s28  }
   0xe   :  { %s1893_s8 = smov [#allocation5]  }
   0xf   :  { %s39_s9 = sshll.u32 %s1893_s8, 4  ;;  %s40_s9 = int_to_ptr.vmem [resolvable:$true] %s39_s9 }
  0x10   :  { %s1852_s10 = scalar_lea.vmem %s40_s9, 16  ;;  %s1856_s11 = scalar_lea.vmem %s40_s9, 32 }
  0x11   :  { %p1853_p5 = scmp.ne.s32.totalorder %s40_s9, %s1852_s10  ;;  %p1857_p6 = scmp.lt.s32.totalorder %s40_s9, %s40_s9 }
  0x12   :  { %p1858_p7 = scmp.lt.s32.totalorder %s1856_s11, %s1852_s10 }
  0x14   :  { %p1859_p8 = por %p1858_p7, %p1857_p6 }
  0x16   :  { %p1860_p9 = pnand %p1859_p8, %p1853_p5 }
  0x18   :  { %1863 = shalt.err (!%p1860_p9)
}
  0x19   :  { %42 = dma.hbm_to_vmem [thread:$0]  %s2204_s4, 16, %s40_s9, [#allocation6]  }
  0x1a   :  { %1884 = dma.done.wait [#allocation3], 256  }
  0x1b   :  { %1885 = vsyncadd [#allocation3], 4294967040 }
  0x1c   :  { %1886 = dma.done.wait [#allocation6], 16  }
  0x1d   :  { %1887 = vsyncadd [#allocation6], 4294967280  ;;  %v1894_v0 = vmov 0.0   ;;  %vm1895_vm0 = vmmov 0   ;;  %vm63_vm1 = vcmask 130048   ;;  %v55_v1 = vld [vmem:[#allocation2 + $0x8] sm:$0xff] }
  0x1e   :  { %1639 = vmatprep.subr.mxu0 %v1894_v0  ;;  %1646 = vmatprep.subr.mxu1 %v1894_v0  ;;  %v54_v2 = vld [vmem:[#allocation2] sm:$0xff]  ;;  %v96_v4 = vand.u32 4294901760, %v55_v1  ;;  %v531_v20 = vld [vmem:[%s2203_s3 + $0x18] sm:$0xff]  ;;  %v530_v22 = vld [vmem:[%s2203_s3 + $0x10] sm:$0xff]  ;;  %vm539_vm2 = vcmask 261120   ;;  %vm1529_vm3 = vcmask 64512  }
  0x1f   :  { %1643 = vmatprep.mubr.msk.f32.mxu0 %vm1895_vm0, %v1894_v0  ;;  %1650 = vmatprep.mubr.msk.f32.mxu1 %vm1895_vm0, %v1894_v0  ;;  %v53_v3 = vld [vmem:[%s2200_s0] sm:$0xff]  ;;  %v99_v5 = vand.u32 4294901760, %v54_v2  ;;  %v1979_v21 = vand.u32 4294901760, %v531_v20  ;;  %v1987_v24 = vand.u32 4294901760, %v530_v22  ;;  %v529_v25 = vld [vmem:[%s2203_s3 + $0x8] sm:$0xff] }
  0x20   :  { %v65_v6 = vsel %vm63_vm1, %v53_v3, 0  ;;  %1640 = vmatpush3.msra.mxu0 %v96_v4  ;;  %v174_v8 = vsub.f32 %v55_v1, %v96_v4  ;;  %v1998_v28 = vand.u32 4294901760, %v529_v25  ;;  %v528_v29 = vld [vmem:[%s2203_s3] sm:$0xff] }
  0x21   :  { %v134_v7 = vand.u32 4294901760, %v65_v6  ;;  %v181_v9 = vsub.f32 %v54_v2, %v99_v5  ;;  %1641 = vmatprep.subr.mxu0 %v1894_v0  ;;  %v1985_v23 = vsub.f32 %v531_v20, %v1979_v21  ;;  %v1996_v27 = vsub.f32 %v530_v22, %v1987_v24  ;;  %v1558_v44 = vld [vmem:[%s2202_s2] ss:$0 sm:$0xff] }
  0x22   :  { %1642 = vmatpush3.msra.mxu0 %v99_v5  ;;  %v175_v11 = vand.u32 4294901760, %v174_v8  ;;  %v2010_v32 = vsub.f32 %v529_v25, %v1998_v28  ;;  %v2012_v33 = vand.u32 4294901760, %v528_v29 }
  0x23   :  { %v135_v10 = vsub.f32 %v65_v6, %v134_v7  ;;  %v182_v12 = vand.u32 4294901760, %v181_v9  ;;  %1653 = vmatprep.subr.mxu0 %v1894_v0  ;;  %v649_v26 = vand.u32 4294901760, %v1985_v23  ;;  %v656_v31 = vand.u32 4294901760, %v1996_v27 }
  0x24   :  { %v176_v14 = vsub.f32 %v174_v8, %v175_v11  ;;  %v663_v36 = vand.u32 4294901760, %v2010_v32  ;;  %v2021_v37 = vsub.f32 %v528_v29, %v2012_v33 }
  0x25   :  { %v136_v13 = vand.u32 4294901760, %v135_v10  ;;  %v183_v15 = vsub.f32 %v181_v9, %v182_v12  ;;  %v650_v30 = vsub.f32 %v1985_v23, %v649_v26  ;;  %v657_v35 = vsub.f32 %v1996_v27, %v656_v31 }
  0x26   :  { %v177_v17 = vand.u32 4294901760, %v176_v14  ;;  %v664_v39 = vsub.f32 %v2010_v32, %v663_v36  ;;  %v670_v40 = vand.u32 4294901760, %v2021_v37 }
  0x27   :  { %v137_v16 = vsub.f32 %v135_v10, %v136_v13  ;;  %v184_v18 = vand.u32 4294901760, %v183_v15  ;;  %v651_v34 = vand.u32 4294901760, %v650_v30  ;;  %v658_v38 = vand.u32 4294901760, %v657_v35 }
  0x28   :  { %1647 = vmatpush3.msra.mxu1 %v177_v17  ;;  %v665_v41 = vand.u32 4294901760, %v664_v39  ;;  %v671_v42 = vsub.f32 %v2021_v37, %v670_v40  ;;  %v1030_v17 = vld [vmem:[%s2205_s5] sm:$0xff] }
  0x29   :  { %v138_v19 = vand.u32 4294901760, %v137_v16  ;;  %1648 = vmatprep.subr.mxu1 %v1894_v0 }
  0x2a   :  { %1649 = vmatpush3.msra.mxu1 %v184_v18  ;;  %v672_v43 = vand.u32 4294901760, %v671_v42 }
  0x2b   :  { %1644 = vmatmul.mubr.f32.vlgmr.msra.gmra.mxu0 %v138_v19  ;;  %1651 = vmatmul.mubr.f32.vlgmr.msra.gmra.mxu1 %v134_v7 }
  0x2c   :  { %1654 = vmatpush3.msra.mxu0 %v174_v8  ;;  %1660 = vmatprep.subr.mxu1 %v1894_v0  ;;  %v1033_v8 = vld [vmem:[%s2205_s5 + $0x18] sm:$0xff] }
  0x2d   :  { %1655 = vmatprep.subr.mxu0 %v1894_v0  ;;  %1657 = vmatprep.mubr.msk.f32.mxu0 %vm1895_vm0, %v1894_v0 }
  0x2e   :  { %1656 = vmatpush3.msra.mxu0 %v181_v9  ;;  %1661 = vmatpush3.msra.mxu1 %v96_v4  ;;  %v2091_v9 = vand.u32 4294901760, %v1033_v8 }
  0x2f   :  { %1658 = vmatmul.mubr.f32.vlgmr.msra.gmra.mxu0 %v135_v10  ;;  %1662 = vmatprep.subr.mxu1 %v1894_v0  ;;  %v1032_v10 = vld [vmem:[%s2205_s5 + $0x10] sm:$0xff] }
  0x30   :  { %1667 = vmatprep.subr.mxu0 %v1894_v0  ;;  %1663 = vmatpush3.msra.mxu1 %v99_v5 }
  0x31   :  { %1664 = vmatprep.mubr.msk.f32.mxu1 %vm1895_vm0, %v1894_v0  ;;  %1668 = vmatpush3.msra.mxu0 %v175_v11  ;;  %v2097_v11 = vsub.f32 %v1033_v8, %v2091_v9 }
  0x32   :  { %1665 = vmatmul.mubr.f32.vlgmr.msra.gmra.mxu1 %v136_v13  ;;  %1669 = vmatprep.subr.mxu0 %v1894_v0  ;;  %v1031_v13 = vld [vmem:[%s2205_s5 + $0x8] sm:$0xff] }
  0x33   :  { %1674 = vmatprep.subr.mxu1 %v1894_v0  ;;  %1670 = vmatpush3.msra.mxu0 %v182_v12  ;;  %v2099_v12 = vand.u32 4294901760, %v1032_v10  ;;  %v1150_v14 = vand.u32 4294901760, %v2097_v11  ;;  %v2110_v16 = vand.u32 4294901760, %v1031_v13 }
  0x34   :  { %1671 = vmatprep.mubr.msk.f32.mxu0 %vm1895_vm0, %v1894_v0  ;;  %1675 = vmatpush3.msra.mxu1 %v96_v4 }
  0x35   :  { %1672 = vmatmul.mubr.f32.vlgmr.msra.gmra.mxu0 %v134_v7  ;;  %1676 = vmatprep.subr.mxu1 %v1894_v0  ;;  %v2108_v15 = vsub.f32 %v1032_v10, %v2099_v12  ;;  %v1151_v18 = vsub.f32 %v2097_v11, %v1150_v14  ;;  %v2122_v20 = vsub.f32 %v1031_v13, %v2110_v16 }
  0x36   :  { %1677 = vmatpush3.msra.mxu1 %v99_v5  ;;  %1678 = vmatprep.mubr.msk.f32.mxu1 %vm1895_vm0, %v1894_v0 }
  0x37   :  { %1679 = vmatmul.mubr.f32.vlgmr.msra.gmra.mxu1 %v134_v7  ;;  %1692 = vmatprep.subr.mxu1 %v1894_v0  ;;  %v1157_v19 = vand.u32 4294901760, %v2108_v15  ;;  %v1152_v22 = vand.u32 4294901760, %v1151_v18 }
  0x38   :  { %1681 = vmatprep.subr.mxu0 %v1894_v0  ;;  %1700 = vmatprep.mubr.msk.f32.mxu1 %vm1895_vm0, %v1894_v0 }
  0x39   :  { %1689 = vmatprep.mubr.msk.f32.mxu0 %vm1895_vm0, %v1894_v0  ;;  %1682 = vmatpush3.msra.mxu0 %v1979_v21 }
  0x3a   :  { %1683 = vmatprep.subr.mxu0 %v1894_v0  ;;  %1693 = vmatpush3.msra.mxu1 %v651_v34 }
  0x3b   :  { %1684 = vmatpush3.msra.mxu0 %v1987_v24  ;;  %1694 = vmatprep.subr.mxu1 %v1894_v0 }
  0x3c   :  { %1685 = vmatprep.subr.mxu0 %v1894_v0  ;;  %1695 = vmatpush3.msra.mxu1 %v658_v38  ;;  %v1559_v38 = vld [vmem:[#allocation5] ss:$0 sm:$0xff] }
  0x3d   :  { %1686 = vmatpush3.msra.mxu0 %v1998_v28  ;;  %1696 = vmatprep.subr.mxu1 %v1894_v0 }
  0x3e   :  { %1687 = vmatprep.subr.mxu0 %v1894_v0  ;;  %1697 = vmatpush3.msra.mxu1 %v665_v41 }
  0x3f   :  { %1688 = vmatpush3.msra.mxu0 %v2012_v33  ;;  %1698 = vmatprep.subr.mxu1 %v1894_v0 }
  0x40   :  { %1703 = vmatprep.subr.mxu0 %v1894_v0  ;;  %1699 = vmatpush3.msra.mxu1 %v672_v43 }
  0x41   :  { %1714 = vmatprep.subr.mxu1 %v1894_v0 }
  0xeb   :  { %v140_v45 = vpop.f32.mrf.mxu0  ;;  %v221_v48 = vpop.f32.mrf.mxu1 }
  0xec   :  { %v141_v46 = vadd.f32 %v1558_v44, %v140_v45 }
  0xed   :  { %v1645_v47 = vpop.f32.mrf.mxu0  ;;  %v1652_v50 = vpop.f32.mrf.mxu1 }
  0xee   :  { %v222_v49 = vadd.f32 %v221_v48, %v141_v46 }
  0xef   :  { %v297_v51 = vpop.f32.mrf.mxu0 }
  0xf0   :  { %v298_v52 = vadd.f32 %v297_v51, %v222_v49 }
  0xf1   :  { %v1659_v53 = vpop.f32.mrf.mxu0 }
  0xf2   :  { %v372_v54 = vpop.f32.mrf.mxu1 }
  0xf3   :  { %v373_v55 = vadd.f32 %v372_v54, %v298_v52 }
  0xf4   :  { %v1666_v56 = vpop.f32.mrf.mxu1 }
  0xf5   :  { %v449_v57 = vpop.f32.mrf.mxu0 }
  0xf6   :  { %v450_v58 = vadd.f32 %v449_v57, %v373_v55 }
  0xf7   :  { %v1673_v59 = vpop.f32.mrf.mxu0  ;;  %v522_v60 = vpop.f32.mrf.mxu1 }
  0xf8   :  { %v523_v61 = vadd.f32 %v522_v60, %v450_v58 }
  0xf9   :  { %v1680_v62 = vpop.f32.mrf.mxu1 }
  0xfa   :  { %v526_v63 = vmul.f32 0.01, %v523_v61 }
  0xfc   :  { %v527_v1 = vmax.f32 %v523_v61, %v526_v63 }
  0xfe   :  { %v541_v2 = vsel %vm539_vm2, %v527_v1, 0 }
  0xff   :  { %v612_v3 = vand.u32 4294901760, %v541_v2 }
 0x101   :  { %v613_v4 = vsub.f32 %v541_v2, %v612_v3  ;;  %1701 = vmatmul.mubr.f32.vlgmr.msra.gmra.mxu1 %v612_v3  ;;  %v1560_v2 = vld [vmem:[%s2206_s6] ss:$0 sm:$0xff]  ;;  %s1896_s6 = smov [#allocation7]  }
 0x102   :  { %1715 = vmatpush3.msra.mxu1 %v1979_v21  ;;  %1722 = vmatprep.mubr.msk.f32.mxu1 %vm1895_vm0, %v1894_v0  ;;  %s1548_s30 = sshll.u32 %s1896_s6, 4  ;;  %s1549_s30 = int_to_ptr.vmem [resolvable:$true] %s1548_s30 }
 0x103   :  { %1716 = vmatprep.subr.mxu1 %v1894_v0  ;;  %v614_v5 = vand.u32 4294901760, %v613_v4  ;;  %s1864_s8 = scalar_lea.vmem %s1549_s30, 128  ;;  %p1869_p11 = scmp.lt.s32.totalorder %s1549_s30, %s1549_s30 }
 0x104   :  { %1717 = vmatpush3.msra.mxu1 %v1987_v24  ;;  %p1865_p10 = scmp.ne.s32.totalorder %s1549_s30, %s1864_s8  ;;  %p1870_p12 = scmp.lt.s32.totalorder %s1864_s8, %s1864_s8 }
 0x105   :  { %1718 = vmatprep.subr.mxu1 %v1894_v0  ;;  %v615_v6 = vsub.f32 %v613_v4, %v614_v5 }
 0x106   :  { %1719 = vmatpush3.msra.mxu1 %v1998_v28  ;;  %p1871_p13 = por %p1870_p12, %p1869_p11 }
 0x107   :  { %1720 = vmatprep.subr.mxu1 %v1894_v0  ;;  %v616_v7 = vand.u32 4294901760, %v615_v6 }
 0x108   :  { %1721 = vmatpush3.msra.mxu1 %v2012_v33  ;;  %p1872_p0 = pnand %p1871_p13, %p1865_p10 }
 0x109   :  { %1723 = vmatmul.mubr.f32.vlgmr.msra.gmra.mxu1 %v614_v5  ;;  %1736 = vmatprep.subr.mxu1 %v1894_v0 }
 0x10a   :  { %1690 = vmatmul.mubr.f32.vlgmr.msra.gmra.mxu0 %v616_v7  ;;  %1737 = vmatpush3.msra.mxu1 %v1979_v21  ;;  %v2124_v21 = vand.u32 4294901760, %v1030_v17 }
 0x10b   :  { %1704 = vmatpush3.msra.mxu0 %v1985_v23  ;;  %1738 = vmatprep.subr.mxu1 %v1894_v0  ;;  %v1158_v23 = vsub.f32 %v2108_v15, %v1157_v19 }
 0x10c   :  { %1705 = vmatprep.subr.mxu0 %v1894_v0  ;;  %1739 = vmatpush3.msra.mxu1 %v1987_v24  ;;  %v1164_v24 = vand.u32 4294901760, %v2122_v20  ;;  %v2133_v25 = vsub.f32 %v1030_v17, %v2124_v21 }
 0x10d   :  { %1706 = vmatpush3.msra.mxu0 %v1996_v27  ;;  %1740 = vmatprep.subr.mxu1 %v1894_v0 }
 0x10e   :  { %1707 = vmatprep.subr.mxu0 %v1894_v0  ;;  %1741 = vmatpush3.msra.mxu1 %v1998_v28  ;;  %v1165_v27 = vsub.f32 %v2122_v20, %v1164_v24  ;;  %v1171_v28 = vand.u32 4294901760, %v2133_v25 }
 0x10f   :  { %1708 = vmatpush3.msra.mxu0 %v2010_v32  ;;  %1742 = vmatprep.subr.mxu1 %v1894_v0 }
 0x110   :  { %1709 = vmatprep.subr.mxu0 %v1894_v0  ;;  %1711 = vmatprep.mubr.msk.f32.mxu0 %vm1895_vm0, %v1894_v0  ;;  %v1166_v29 = vand.u32 4294901760, %v1165_v27  ;;  %v1172_v30 = vsub.f32 %v2133_v25, %v1171_v28 }
 0x111   :  { %1710 = vmatpush3.msra.mxu0 %v2021_v37  ;;  %1743 = vmatpush3.msra.mxu1 %v2012_v33 }
 0x112   :  { %1744 = vmatprep.mubr.msk.f32.mxu1 %vm1895_vm0, %v1894_v0  ;;  %1712 = vmatmul.mubr.f32.vlgmr.msra.gmra.mxu0 %v613_v4 }
 0x113   :  { %1725 = vmatprep.subr.mxu0 %v1894_v0  ;;  %1745 = vmatmul.mubr.f32.vlgmr.msra.gmra.mxu1 %v612_v3 }
 0x114   :  { %1726 = vmatpush3.msra.mxu0 %v649_v26  ;;  %1733 = vmatprep.mubr.msk.f32.mxu0 %vm1895_vm0, %v1894_v0  ;;  %v1159_v26 = vand.u32 4294901760, %v1158_v23 }
 0x115   :  { %1727 = vmatprep.subr.mxu0 %v1894_v0  ;;  %1758 = vmatprep.subr.mxu1 %v1894_v0 }
 0x116   :  { %1728 = vmatpush3.msra.mxu0 %v656_v31  ;;  %1766 = vmatprep.mubr.msk.f32.mxu1 %vm1895_vm0, %v1894_v0  ;;  %v1173_v31 = vand.u32 4294901760, %v1172_v30 }
 0x117   :  { %1729 = vmatprep.subr.mxu0 %v1894_v0  ;;  %1759 = vmatpush3.msra.mxu1 %v1152_v22 }
 0x118   :  { %1730 = vmatpush3.msra.mxu0 %v663_v36  ;;  %1760 = vmatprep.subr.mxu1 %v1894_v0 }
 0x119   :  { %1731 = vmatprep.subr.mxu0 %v1894_v0  ;;  %1761 = vmatpush3.msra.mxu1 %v1159_v26 }
 0x11a   :  { %1732 = vmatpush3.msra.mxu0 %v670_v40  ;;  %1762 = vmatprep.subr.mxu1 %v1894_v0 }
 0x11b   :  { %1734 = vmatmul.mubr.f32.vlgmr.msra.gmra.mxu0 %v612_v3  ;;  %1747 = vmatprep.subr.mxu0 %v1894_v0 }
 0x11c   :  { %1755 = vmatprep.mubr.msk.f32.mxu0 %vm1895_vm0, %v1894_v0  ;;  %1748 = vmatpush3.msra.mxu0 %v2091_v9 }
 0x11d   :  { %1749 = vmatprep.subr.mxu0 %v1894_v0  ;;  %1763 = vmatpush3.msra.mxu1 %v1166_v29 }
 0x11e   :  { %1750 = vmatpush3.msra.mxu0 %v2099_v12  ;;  %1764 = vmatprep.subr.mxu1 %v1894_v0 }
 0x11f   :  { %1751 = vmatprep.subr.mxu0 %v1894_v0  ;;  %1765 = vmatpush3.msra.mxu1 %v1173_v31 }
 0x120   :  { %1752 = vmatpush3.msra.mxu0 %v2110_v16  ;;  %1780 = vmatprep.subr.mxu1 %v1894_v0 }
 0x121   :  { %1753 = vmatprep.subr.mxu0 %v1894_v0 }
 0x122   :  { %1754 = vmatpush3.msra.mxu0 %v2124_v21 }
 0x123   :  { %1769 = vmatprep.subr.mxu0 %v1894_v0 }
 0x1c1   :  { %v709_v32 = vpop.f32.mrf.mxu1 }
 0x1c3   :  { %v1702_v33 = vpop.f32.mrf.mxu1 }
 0x1c9   :  { %v866_v34 = vpop.f32.mrf.mxu1 }
 0x1ca   :  { %v618_v35 = vpop.f32.mrf.mxu0 }
 0x1cb   :  { %v1724_v36 = vpop.f32.mrf.mxu1  ;;  %v619_v39 = vadd.f32 %v1559_v38, %v618_v35 }
 0x1cc   :  { %v1691_v37 = vpop.f32.mrf.mxu0 }
 0x1cd   :  { %v710_v42 = vadd.f32 %v709_v32, %v619_v39 }
 0x1d2   :  { %v789_v40 = vpop.f32.mrf.mxu0 }
 0x1d3   :  { %v1024_v41 = vpop.f32.mrf.mxu1  ;;  %v790_v45 = vadd.f32 %v789_v40, %v710_v42 }
 0x1d4   :  { %v1713_v43 = vpop.f32.mrf.mxu0 }
 0x1d5   :  { %v1746_v44 = vpop.f32.mrf.mxu1  ;;  %v867_v46 = vadd.f32 %v866_v34, %v790_v45 }
 0x1db   :  { %v949_v47 = vpop.f32.mrf.mxu0 }
 0x1dc   :  { %v950_v48 = vadd.f32 %v949_v47, %v867_v46 }
 0x1dd   :  { %v1735_v49 = vpop.f32.mrf.mxu0 }
 0x1de   :  { %v1025_v50 = vadd.f32 %v1024_v41, %v950_v48 }
 0x1e0   :  { %v1028_v51 = vmul.f32 0.01, %v1025_v50 }
 0x1e2   :  { %v1029_v52 = vmax.f32 %v1025_v50, %v1028_v51 }
 0x1e4   :  { %v1042_v53 = vsel %vm539_vm2, %v1029_v52, 0 }
 0x1e5   :  { %v1113_v54 = vand.u32 4294901760, %v1042_v53 }
 0x1e7   :  { %v1114_v55 = vsub.f32 %v1042_v53, %v1113_v54  ;;  %1767 = vmatmul.mubr.f32.vlgmr.msra.gmra.mxu1 %v1113_v54 }
 0x1e8   :  { %1781 = vmatpush3.msra.mxu1 %v2091_v9  ;;  %1788 = vmatprep.mubr.msk.f32.mxu1 %vm1895_vm0, %v1894_v0 }
 0x1e9   :  { %1782 = vmatprep.subr.mxu1 %v1894_v0  ;;  %v1115_v56 = vand.u32 4294901760, %v1114_v55 }
 0x1ea   :  { %1783 = vmatpush3.msra.mxu1 %v2099_v12 }
 0x1eb   :  { %1784 = vmatprep.subr.mxu1 %v1894_v0  ;;  %v1116_v57 = vsub.f32 %v1114_v55, %v1115_v56 }
 0x1ec   :  { %1785 = vmatpush3.msra.mxu1 %v2110_v16 }
 0x1ed   :  { %1786 = vmatprep.subr.mxu1 %v1894_v0  ;;  %v1117_v58 = vand.u32 4294901760, %v1116_v57 }
 0x1ee   :  { %1787 = vmatpush3.msra.mxu1 %v2124_v21 }
 0x1ef   :  { %1789 = vmatmul.mubr.f32.vlgmr.msra.gmra.mxu1 %v1115_v56  ;;  %1802 = vmatprep.subr.mxu1 %v1894_v0 }
 0x1f0   :  { %1756 = vmatmul.mubr.f32.vlgmr.msra.gmra.mxu0 %v1117_v58  ;;  %1803 = vmatpush3.msra.mxu1 %v2091_v9 }
 0x1f1   :  { %1770 = vmatpush3.msra.mxu0 %v2097_v11  ;;  %1804 = vmatprep.subr.mxu1 %v1894_v0 }
 0x1f2   :  { %1771 = vmatprep.subr.mxu0 %v1894_v0  ;;  %1805 = vmatpush3.msra.mxu1 %v2099_v12 }
 0x1f3   :  { %1772 = vmatpush3.msra.mxu0 %v2108_v15  ;;  %1806 = vmatprep.subr.mxu1 %v1894_v0 }
 0x1f4   :  { %1773 = vmatprep.subr.mxu0 %v1894_v0  ;;  %1807 = vmatpush3.msra.mxu1 %v2110_v16 }
 0x1f5   :  { %1774 = vmatpush3.msra.mxu0 %v2122_v20  ;;  %1808 = vmatprep.subr.mxu1 %v1894_v0 }
 0x1f6   :  { %1775 = vmatprep.subr.mxu0 %v1894_v0  ;;  %1777 = vmatprep.mubr.msk.f32.mxu0 %vm1895_vm0, %v1894_v0 }
 0x1f7   :  { %1776 = vmatpush3.msra.mxu0 %v2133_v25  ;;  %1809 = vmatpush3.msra.mxu1 %v2124_v21 }
 0x1f8   :  { %1810 = vmatprep.mubr.msk.f32.mxu1 %vm1895_vm0, %v1894_v0  ;;  %1778 = vmatmul.mubr.f32.vlgmr.msra.gmra.mxu0 %v1114_v55 }
 0x1f9   :  { %1791 = vmatprep.subr.mxu0 %v1894_v0  ;;  %1811 = vmatmul.mubr.f32.vlgmr.msra.gmra.mxu1 %v1113_v54 }
 0x1fa   :  { %1792 = vmatpush3.msra.mxu0 %v1150_v14  ;;  %1799 = vmatprep.mubr.msk.f32.mxu0 %vm1895_vm0, %v1894_v0 }
 0x1fb   :  { %1793 = vmatprep.subr.mxu0 %v1894_v0 }
 0x1fc   :  { %1794 = vmatpush3.msra.mxu0 %v1157_v19 }
 0x1fd   :  { %1795 = vmatprep.subr.mxu0 %v1894_v0 }
 0x1fe   :  { %1796 = vmatpush3.msra.mxu0 %v1164_v24 }
 0x1ff   :  { %1797 = vmatprep.subr.mxu0 %v1894_v0 }
 0x200   :  { %1798 = vmatpush3.msra.mxu0 %v1171_v28 }
 0x201   :  { %1800 = vmatmul.mubr.f32.vlgmr.msra.gmra.mxu0 %v1113_v54 }
 0x2a7   :  { %v1210_v59 = vpop.f32.mrf.mxu1 }
 0x2a9   :  { %v1768_v60 = vpop.f32.mrf.mxu1 }
 0x2af   :  { %v1367_v61 = vpop.f32.mrf.mxu1 }
 0x2b0   :  { %v1119_v62 = vpop.f32.mrf.mxu0 }
 0x2b1   :  { %v1790_v63 = vpop.f32.mrf.mxu1  ;;  %v1120_v3 = vadd.f32 %v1560_v2, %v1119_v62 }
 0x2b2   :  { %v1757_v1 = vpop.f32.mrf.mxu0 }
 0x2b3   :  { %v1211_v6 = vadd.f32 %v1210_v59, %v1120_v3 }
 0x2b8   :  { %v1290_v4 = vpop.f32.mrf.mxu0 }
 0x2b9   :  { %v1525_v5 = vpop.f32.mrf.mxu1  ;;  %v1291_v8 = vadd.f32 %v1290_v4, %v1211_v6 }
 0x2ba   :  { %v1779_v7 = vpop.f32.mrf.mxu0 }
 0x2bb   :  { %v1812_v0 = vpop.f32.mrf.mxu1  ;;  %v1368_v9 = vadd.f32 %v1367_v61, %v1291_v8 }
 0x2c1   :  { %v1450_v10 = vpop.f32.mrf.mxu0 }
 0x2c2   :  { %v1451_v11 = vadd.f32 %v1450_v10, %v1368_v9 }
 0x2c3   :  { %v1801_v12 = vpop.f32.mrf.mxu0 }
 0x2c4   :  { %v1526_v13 = vadd.f32 %v1525_v5, %v1451_v11 }
 0x2c6   :  { %v1530_v14 = vsel %vm1529_vm3, %v1526_v13, -inf }
 0x2c7   :  { %1531 = vmax.xlane.f32.xlu0 %v1530_v14 }
 0x350   :  { %v1532_v15 = vpop.xlane.xlu0 %1531 }
 0x351   :  { %v1533_v16 = vsub.f32 %v1526_v13, %v1532_v15 }
 0x353   :  { %v1534_v17 = vmul.f32 1.442695, %v1533_v16 }
 0x355   :  { %1820 = vpow2.f32 %v1534_v17 }
 0x362   :  { %v1821_v18 = vpop.eup %1820 }
 0x363   :  { %v1536_v19 = vsel %vm1529_vm3, %v1821_v18, 0.0 }
 0x364   :  { %1537 = vadd.xlane.f32.xlu0 %v1536_v19 }
 0x3ed   :  { %v1538_v20 = vpop.xlane.xlu0 %1537 }
 0x3ee   :  { %1822 = vrcp.f32 %v1538_v20 }
 0x3fb   :  { %v1823_v21 = vpop.eup %1822 }
 0x3fc   :  { %v1540_v22 = vmul.f32 %v1823_v21, %v1821_v18 }
 0x3fe   :  { %1541 = vst.msk [vmem:[#allocation7] sm:$0xff] %vm1529_vm3, %v1540_v22 }
 0x3ff   :  { %1875 = shalt.err (!%p1872_p0)
}
 0x400   :  { %1551 = dma.vmem_to_hbm [thread:$0]  %s1549_s30, 128, %s2207_s7, [#allocation4]  }
 0x401   :  { %1888 = dma.done.wait [#allocation4], 128  }
 0x402   :  { %1889 = vsyncadd [#allocation4], 4294967168 }
 0x403   :  { %1555 = vsyncpa [#allocation3], 1 }
 0x404   :  { %1556 = vsyncpa [#allocation6], 1 }
 0x405   :  { %1557 = vsyncpa [#allocation4], 1 }

</bundles_post_ra>
